<compile_context>
chip_gen: v7x
topology: tpu7x:2x2x1
jax: 0.10.0
libtpu: 0.0.40
codegen_flags: <defaults>
</compile_context>

<pallas_src>
import functools

import jax
import jax.numpy as jnp
from jax import lax
from jax.experimental import pallas as pl
from jax.experimental.pallas import tpu as pltpu


def _center_loss_kernel(x_ref, d2g_ref, out_ref, *, batch):
    """Grid: (num_b_tiles,), 'parallel' (each step owns its output block).

    x_ref:   (tb, D)       x tile in its native dtype (upcast to f32 here)
    d2g_ref: (tb, 1)  f32  ||centers[y_b]||^2 per row (precomputed in wrapper)
    out_ref: (8, 128) f32  this tile's partial sum; only element [0, 0] nonzero
    """
    i = pl.program_id(0)
    tb = x_ref.shape[0]

    x = x_ref[...].astype(jnp.float32)                        # (tb, D)
    d1 = jnp.sum(x * x, axis=1, keepdims=True)                # (tb, 1)

    # clamp(min=1e-12, max=1e12), matching the reference.
    vals = jnp.clip(d1 + d2g_ref[...], 1e-12, 1e12)           # (tb, 1)

    # Mask padded rows of the ragged last tile (global row index >= batch);
    # any garbage in the out-of-bounds block region is select-masked away.
    row = i * tb + lax.broadcasted_iota(jnp.int32, (tb, 1), 0)
    vals = jnp.where(row < batch, vals, 0.0)

    partial = jnp.sum(vals)                                    # f32 scalar

    # Lane-dense, fully aligned (8, 128) output block; partial lands at [0, 0]
    # so the wrapper can just sum the whole partials array exactly.
    r = lax.broadcasted_iota(jnp.int32, (8, 128), 0)
    c = lax.broadcasted_iota(jnp.int32, (8, 128), 1)
    out_ref[...] = jnp.where((r == 0) & (c == 0), partial, 0.0)


def _pick_tile_b(batch, dim, *, target_block_bytes=2 << 20, max_tile=8192):
    """~1-2 MiB x tiles amortize per-step overhead; 2x double-buffered this
    stays well under the v5e 16 MiB default scoped-VMEM limit (and v6e/v7x)."""
    tb = target_block_bytes // (4 * max(int(dim), 1))
    tb = max(8, min(int(tb), max_tile))
    tb = (tb // 8) * 8
    return batch if tb >= batch else tb


def center_loss(x, y, centers, *, tile_b=None, interpret=False):
    """x: (B, D) f32/bf16, y: (B,) int labels in [0, C), centers: (C, D) -> scalar.

    NOTE: labels outside [0, C) are clamped by the wrapper gather (JAX default)
    instead of erroring like PyTorch; out-of-range labels are out of contract.
    """
    B, D = x.shape
    C, Dc = centers.shape
    assert Dc == D, "feature dims of x and centers must match"

    # O(C*D + B) prep in the wrapper: per-class squared norms, gathered per row.
    d2 = jnp.sum(centers.astype(jnp.float32) ** 2, axis=1)     # (C,)
    d2g = d2[y.astype(jnp.int32)].reshape(B, 1)                # (B, 1) f32

    if tile_b is None:
        tb = _pick_tile_b(B, D)
    else:
        tb = max(8, ((min(int(tile_b), B) + 7) // 8) * 8)
        if tb >= B:
            tb = B
    n_tiles = pl.cdiv(B, tb)

    partials = pl.pallas_call(
        functools.partial(_center_loss_kernel, batch=B),
        out_shape=jax.ShapeDtypeStruct((n_tiles * 8, 128), jnp.float32),
        grid_spec=pltpu.PrefetchScalarGridSpec(
            num_scalar_prefetch=0,
            grid=(n_tiles,),
            in_specs=[
                pl.BlockSpec((tb, D), lambda i: (i, 0)),   # x tile, streamed once
                pl.BlockSpec((tb, 1), lambda i: (i, 0)),   # per-row ||c_y||^2
            ],
            out_specs=pl.BlockSpec((8, 128), lambda i: (i, 0)),
        ),
        # No carried state -> the single grid axis is truly parallel (lets the
        # runtime shard batch tiles across both TensorCores on v7x).
        compiler_params=pltpu.CompilerParams(dimension_semantics=("parallel",)),
        interpret=interpret,
    )(x, d2g)

    # Each masked-out (zero) reference entry clamps to 1e-12; add that tail.
    corr = jnp.float32(B * (C - 1) * 1e-12)
    return (jnp.sum(partials) + corr) / jnp.float32(B)


def center_loss_ref(x, y, centers):
    """Pure-JAX reference matching the (discarded-addmm) PyTorch semantics."""
    B = x.shape[0]
    C = centers.shape[0]
    d1 = jnp.sum(x ** 2, axis=1, keepdims=True)              # (B, 1)
    d2 = jnp.sum(centers ** 2, axis=1, keepdims=True).T      # (1, C)
    d = d1 + d2                                              # (B, C)
    classes = jnp.arange(C, dtype=jnp.int32)
    mask = (y[:, None].astype(jnp.int32) == classes[None, :]).astype(jnp.float32)
    dist = jnp.clip(d * mask, 1e-12, 1e12)
    return jnp.sum(dist) / B


if __name__ == "__main__":
    key = jax.random.PRNGKey(0)
    k1, k2, k3 = jax.random.split(key, 3)

    # Small shapes consistent with the module: batch=8, dim=32, num_classes=16.
    B, D, C = 8, 32, 16
    centers = jax.random.uniform(k1, (C, D), dtype=jnp.float32)   # torch.rand init
    x = jax.random.normal(k2, (B, D), dtype=jnp.float32)
    y = jax.random.randint(k3, (B,), 0, C, dtype=jnp.int32)

    loss = center_loss(x, y, centers)
    jax.block_until_ready(loss)
    ref = center_loss_ref(x, y, centers)
    assert jnp.allclose(loss, ref, rtol=1e-5, atol=1e-6), (loss, ref)

    # Unaligned batch split across several tiles: exercises the ragged last
    # tile, the row mask, and the per-tile partial outputs.
    k4, k5, k6 = jax.random.split(jax.random.PRNGKey(1), 3)
    B2, D2, C2 = 40, 48, 10
    centers2 = jax.random.uniform(k4, (C2, D2), dtype=jnp.float32)
    x2 = jax.random.normal(k5, (B2, D2), dtype=jnp.float32)
    y2 = jax.random.randint(k6, (B2,), 0, C2, dtype=jnp.int32)
    loss2 = center_loss(x2, y2, centers2, tile_b=16)
    jax.block_until_ready(loss2)
    ref2 = center_loss_ref(x2, y2, centers2)
    assert jnp.allclose(loss2, ref2, rtol=1e-5, atol=1e-6), (loss2, ref2)

    # bf16 features streamed natively (upcast in-kernel); batch not a multiple
    # of 8 so the single x block equals the full array dims.
    k7, k8, k9 = jax.random.split(jax.random.PRNGKey(2), 3)
    B3, D3, C3 = 300, 64, 50
    centers3 = jax.random.uniform(k7, (C3, D3), dtype=jnp.float32)
    x3 = jax.random.normal(k8, (B3, D3), dtype=jnp.bfloat16)
    y3 = jax.random.randint(k9, (B3,), 0, C3, dtype=jnp.int32)
    loss3 = center_loss(x3, y3, centers3)
    jax.block_until_ready(loss3)
    ref3 = center_loss_ref(x3.astype(jnp.float32), y3, centers3)
    assert jnp.allclose(loss3, ref3, rtol=1e-4, atol=1e-5), (loss3, ref3)

    print("KERNEL_OK")
</pallas_src>

<mosaic_0001>
module attributes {stable_mosaic.version = 11 : i64} {
  func.func @_center_loss_kernel(%arg0: i32, %arg1: memref<8x32xf32, #tpu.memory_space<vmem>>, %arg2: memref<8x1xf32, #tpu.memory_space<vmem>>, %arg3: memref<8x128xf32, #tpu.memory_space<vmem>>) attributes {dimension_semantics = [#tpu.dimension_semantics<parallel>], iteration_bounds = array<i64: 1>, scalar_prefetch = 0 : i64, scratch_operands = 0 : i64, tpu.core_type = #tpu.core_type<tc>, window_params = [{transform_indices = @transform_0, window_bounds = array<i64: 8, 32>}, {transform_indices = @transform_1, window_bounds = array<i64: 8, 1>}, {transform_indices = @transform_2, window_bounds = array<i64: 8, 128>}]} {
    %c0 = arith.constant 0 : index
    %c0_0 = arith.constant 0 : index
    %0 = vector.load %arg1[%c0, %c0_0] : memref<8x32xf32, #tpu.memory_space<vmem>>, vector<8x32xf32>
    %1 = arith.mulf %0, %0 : vector<8x32xf32>
    %cst = arith.constant dense<0.000000e+00> : vector<8xf32>
    %2 = vector.multi_reduction <add>, %1, %cst [1] : vector<8x32xf32> to vector<8xf32>
    %3 = vector.shape_cast %2 : vector<8xf32> to vector<8x1xf32>
    %c0_1 = arith.constant 0 : index
    %c0_2 = arith.constant 0 : index
    %4 = vector.load %arg2[%c0_1, %c0_2] : memref<8x1xf32, #tpu.memory_space<vmem>>, vector<8x1xf32>
    %5 = arith.addf %3, %4 : vector<8x1xf32>
    %cst_3 = arith.constant 9.99999996E-13 : f32
    %cst_4 = arith.constant 9.99999995E+11 : f32
    %6 = vector.broadcast %cst_3 : f32 to vector<8x1xf32>
    %7 = arith.maximumf %6, %5 : vector<8x1xf32>
    %8 = vector.broadcast %cst_4 : f32 to vector<8x1xf32>
    %9 = arith.minimumf %8, %7 : vector<8x1xf32>
    %c8_i32 = arith.constant 8 : i32
    %10 = arith.muli %arg0, %c8_i32 : i32
    %11 = tpu.iota {dimensions = array<i32: 0>} : vector<8x1xi32>
    %12 = vector.broadcast %10 : i32 to vector<8x1xi32>
    %13 = arith.addi %12, %11 : vector<8x1xi32>
    %c8_i32_5 = arith.constant 8 : i32
    %14 = vector.broadcast %c8_i32_5 : i32 to vector<8x1xi32>
    %15 = arith.cmpi slt, %13, %14 : vector<8x1xi32>
    %cst_6 = arith.constant 0.000000e+00 : f32
    %16 = vector.broadcast %cst_6 : f32 to vector<8x1xf32>
    %17 = arith.select %15, %9, %16 : vector<8x1xi1>, vector<8x1xf32>
    %18 = vector.shape_cast %17 : vector<8x1xf32> to vector<1x8x1xf32>
    %cst_7 = arith.constant dense<0.000000e+00> : vector<1xf32>
    %19 = vector.multi_reduction <add>, %18, %cst_7 [1, 2] : vector<1x8x1xf32> to vector<1xf32>
    %20 = vector.shape_cast %19 : vector<1xf32> to vector<1x1x1xf32>
    %21 = vector.extract %20[0, 0, 0] : f32 from vector<1x1x1xf32>
    %22 = tpu.iota {dimensions = array<i32: 0>} : vector<8x128xi32>
    %23 = tpu.iota {dimensions = array<i32: 1>} : vector<8x128xi32>
    %c0_i32 = arith.constant 0 : i32
    %24 = vector.broadcast %c0_i32 : i32 to vector<8x128xi32>
    %25 = arith.cmpi eq, %22, %24 : vector<8x128xi32>
    %c0_i32_8 = arith.constant 0 : i32
    %26 = vector.broadcast %c0_i32_8 : i32 to vector<8x128xi32>
    %27 = arith.cmpi eq, %23, %26 : vector<8x128xi32>
    %28 = arith.andi %25, %27 : vector<8x128xi1>
    %cst_9 = arith.constant 0.000000e+00 : f32
    %29 = vector.broadcast %21 : f32 to vector<8x128xf32>
    %30 = vector.broadcast %cst_9 : f32 to vector<8x128xf32>
    %31 = arith.select %28, %29, %30 : vector<8x128xi1>, vector<8x128xf32>
    %c0_10 = arith.constant 0 : index
    %c0_11 = arith.constant 0 : index
    %32 = vector.load %arg3[%c0_10, %c0_11] : memref<8x128xf32, #tpu.memory_space<vmem>>, vector<8x128xf32>
    tpu.vector_store %arg3[%c0_10, %c0_11], %31 {strides = array<i32>} : memref<8x128xf32, #tpu.memory_space<vmem>>, vector<8x128xf32>,
    return
  }
  func.func @transform_0(%arg0: i32) -> (i32, i32) {
    %c0_i32 = arith.constant 0 : i32
    %c0_i32_0 = arith.constant 0 : i32
    return %arg0, %c0_i32 : i32, i32
  }
  func.func @transform_1(%arg0: i32) -> (i32, i32) {
    %c0_i32 = arith.constant 0 : i32
    %c0_i32_0 = arith.constant 0 : i32
    return %arg0, %c0_i32 : i32, i32
  }
  func.func @transform_2(%arg0: i32) -> (i32, i32) {
    %c0_i32 = arith.constant 0 : i32
    %c0_i32_0 = arith.constant 0 : i32
    return %arg0, %c0_i32 : i32, i32
  }
}

</mosaic_0001>

<bundles_post_ra>
// kernel: tpu_custom_call.1
= control target key start
LH: loop header
LB: loop body
LE: loop exit
PB: predicated region body
PF: predicated region fallthrough
CT: control target
= control target key end

     0   :  { %vm14_vm0 = vcmask 261120   ;;  %s123_s0 = inlined_call_operand.vmem [shape: f32[8,32], index: 0, kind: input, shape index: {}]   ;;  %s124_s1 = inlined_call_operand.vmem [shape: f32[8,1], index: 1, kind: input, shape index: {}]   ;;  %s125_s2 = inlined_call_operand.hbm [shape: f32[8,128], index: 2, kind: output, shape index: {}]  }
   0x1   :  { %v12_v0 = vld [vmem:[%s123_s0] sm:$0xff] }
   0x2   :  { %7 = vsyncpa [#allocation3], 0  ;;  %v13_v1 = vmul.f32 %v12_v0, %v12_v0  ;;  %v18_v3 = vld [vmem:[%s124_s1] sm:$0xff]  ;;  %vm29_vm1 = vcmask 7168   ;;  %v23_v16 = vlaneseq  ;;  %s89_s0 = smov [#allocation2]  }
   0x3   :  { %s54_s1 = sshll.u32 %s89_s0, 4  ;;  %s55_s1 = int_to_ptr.vmem [resolvable:$true] %s54_s1 }
   0x4   :  { %v15_v2 = vsel %vm14_vm0, %v13_v1, 0.0  ;;  %v24_v17 = vshrl.u32 %v23_v16, 7  ;;  %v41_v18 = vand.u32 127, %v23_v16  ;;  %s65_s14 = scalar_lea.vmem %s55_s1, 128  ;;  %p70_p1 = scmp.lt.s32.totalorder %s55_s1, %s55_s1 }
   0x5   :  { %16 = vadd.xlane.f32.xlu0 %v15_v2  ;;  %p66_p0 = scmp.ne.s32.totalorder %s55_s1, %s65_s14  ;;  %p71_p2 = scmp.lt.s32.totalorder %s65_s14, %s65_s14 }
   0x6   :  { %vm42_vm2 = vcmp.eq.s32.totalorder %v24_v17, 0  ;;  %vm43_vm3 = vcmp.eq.s32.totalorder %v41_v18, 0 }
   0x7   :  { %vm44_vm4 = vmand %vm42_vm2, %vm43_vm3  ;;  %p72_p3 = por %p71_p2, %p70_p1 }
   0x9   :  { %p73_p4 = pnand %p72_p3, %p66_p0 }
  0x92   :  { %v17_v4 = vpop.xlane.xlu0 %16 }
  0x93   :  { %v19_v5 = vadd.f32 %v18_v3, %v17_v4 }
  0x95   :  { %v20_v6 = vmax.f32 %v19_v5, 1e-12 }
  0x97   :  { %v21_v7 = vmin.f32 %v20_v6, 1e+12 }
  0x99   :  { %v30_v8 = vsel %vm29_vm1, %v21_v7, 0.0 }
  0x9a   :  { %31 = vadd.xlane.f32.xlu0 %v30_v8 }
 0x127   :  { %v32_v9 = vpop.xlane.xlu0 %31 }
 0x128   :  { %v33_v10 = vrot.slane %v32_v9, 4 }
 0x12a   :  { %v34_v11 = vadd.f32 %v33_v10, %v32_v9 }
 0x12c   :  { %v35_v12 = vrot.slane %v34_v11, 2 }
 0x12e   :  { %v36_v13 = vadd.f32 %v35_v12, %v34_v11 }
 0x130   :  { %v37_v14 = vrot.slane %v36_v13, 1 }
 0x132   :  { %v38_v15 = vadd.f32 %v37_v14, %v36_v13 }
 0x134   :  { %62 = vpush %v38_v15 }
 0x165   :  { %s63_s13 = spop %62 }
 0x166   :  { %v45_v19 = vstv %s63_s13 }
 0x167   :  { %v46_v20 = vsel %vm44_vm4, %v45_v19, 0.0 }
 0x168   :  { %47 = vst [vmem:[#allocation2] sm:$0xff] %v46_v20 }
 0x169   :  { %76 = shalt.err (!%p73_p4)
}
 0x16a   :  { %s77_s17 = scalar_lea.hbm %s125_s2, 128 }
 0x16b   :  { %p78_p5 = scmp.ne.s32.totalorder %s125_s2, %s77_s17  ;;  %p81_p6 = scmp.lt.u32.totalorder %s77_s17, %s125_s2 }
 0x16d   :  { %p83_p7 = pnand %p81_p6, %p78_p5 }
 0x16f   :  { %86 = shalt.err (!%p83_p7)
}
 0x170   :  { %57 = dma.vmem_to_hbm [thread:$0]  %s55_s1, 128, %s125_s2, [#allocation3]  }
 0x171   :  { %87 = dma.done.wait [#allocation3], 128  }
 0x172   :  { %88 = vsyncadd [#allocation3], 4294967168 }
 0x173   :  { %61 = vsyncpa [#allocation3], 1 }

</bundles_post_ra>
